<compile_context>
chip_gen: v6e
topology: v6e:2x2x1
jax: 0.10.0
libtpu: 0.0.40
codegen_flags: <defaults>
</compile_context>

<pallas_src>
import functools
import math

import jax
import jax.numpy as jnp
from jax.experimental import pallas as pl
from jax.experimental.pallas import tpu as pltpu


def _round_up(n, m):
    return ((n + m - 1) // m) * m


# ----------------------------- activations ---------------------------------

def _apply_activation(name, x, prelu_w=None):
    if name == "sigmoid":
        return jax.nn.sigmoid(x)
    if name == "tanh":
        return jnp.tanh(x)
    if name == "relu":
        return jnp.maximum(x, 0.0)
    if name == "prelu":
        # nn.PReLU(): y = max(0, x) + a * min(0, x), scalar a (init 0.25)
        return jnp.maximum(x, 0.0) + prelu_w * jnp.minimum(x, 0.0)
    raise ValueError(f"unknown activation {name!r}")


# ------------------------------ kernel --------------------------------------

def _densenet_kernel(*refs, layer_descrs, activation, compute_dtype):
    """refs = (x_ref, *param_refs, o_ref).

    layer_descrs: tuple of (kind, col_off, n_out, has_bias, has_prelu) with
      kind 'fe'     -> feature-extractor layer (output replaces the features)
           'concat' -> ConcatLayer: output merged into its lane slot
           'final'  -> last bias-free Linear + ReLU, lane-padded output
    Each layer consumes one pre-packed weight slab (+ optional bias slab and
    PReLU scalar) from param_refs, in order.
    """
    x_ref = refs[0]
    o_ref = refs[-1]
    params = refs[1:-1]

    # Single dense feature buffer, kept in the param dtype (cast once when a
    # value is produced; the MXU accumulates in f32 regardless).
    feat = x_ref[...].astype(compute_dtype)

    idx = 0
    for kind, off, n_out, has_bias, has_prelu in layer_descrs:
        w_ref = params[idx]
        idx += 1
        b_ref = params[idx] if has_bias else None
        idx += int(has_bias)
        pw_ref = params[idx] if has_prelu else None
        idx += int(has_prelu)

        # One MXU dot per layer (zero rows/columns in the slab keep it exact).
        y = jnp.dot(feat, w_ref[...], preferred_element_type=jnp.float32)
        if b_ref is not None:
            y = y + b_ref[...]

        if kind == "final":
            o_ref[...] = jnp.maximum(y, 0.0).astype(o_ref.dtype)
        else:
            pw = pw_ref[0].astype(jnp.float32) if has_prelu else None
            h = _apply_activation(activation, y, pw).astype(compute_dtype)
            # Merge the new features into their lane slot: pure VPU select,
            # no concatenation / cross-lane movement.
            lanes = jax.lax.broadcasted_iota(jnp.int32, h.shape, 1)
            mask = (lanes >= off) & (lanes < off + n_out)
            if kind == "fe":
                feat = jnp.where(mask, h, jnp.zeros_like(h))
            else:  # 'concat': torch.cat((x, out), dim=1) semantics
                feat = jnp.where(mask, h, feat)


# --------------------------- parameter setup --------------------------------

def build_densenet(key, net_arch, activation, feature_extractor=False, bias=True):
    """Deterministically builds full (PyTorch-shaped) params mirroring DenseNet.__init__.

    Returns (layers, out_dim); each layer is a dict with:
      kind : 'fe' | 'concat' | 'final'
      w    : transposed weight, shape (in, out)   (nn.Linear weight.T)
      b    : bias, shape (1, out) or None
      prelu: (1,) scalar or None
    """

    def linear(k, in_dim, out_dim, with_bias):
        kw, kb = jax.random.split(k)
        bound = 1.0 / math.sqrt(in_dim)  # PyTorch default init
        w_t = jax.random.uniform(kw, (in_dim, out_dim), jnp.float32, -bound, bound)
        b = (jax.random.uniform(kb, (1, out_dim), jnp.float32, -bound, bound)
             if with_bias else None)
        return w_t, b

    layers = []
    arch = list(net_arch)
    use_prelu = activation == "prelu"
    keys = jax.random.split(key, len(arch) + 2)
    ki = 0

    def prelu_param():
        # 1-D scalar so it lands in SMEM without 2-D [8,128]-word padding.
        return jnp.full((1,), 0.25, jnp.float32) if use_prelu else None

    if feature_extractor:
        w, b = linear(keys[ki], arch[0], arch[1], bias)
        ki += 1
        layers.append(dict(kind="fe", w=w, b=b, prelu=prelu_param()))
        arch = arch[1:]

    skip = arch[0]
    for i in range(1, len(arch) - 1):
        w, b = linear(keys[ki], skip, arch[i], bias)
        ki += 1
        layers.append(dict(kind="concat", w=w, b=b, prelu=prelu_param()))
        skip += arch[i]

    # final Linear(skip, arch[-1], bias=False) + ReLU
    w, _ = linear(keys[ki], skip, arch[-1], False)
    layers.append(dict(kind="final", w=w, b=None, prelu=None))
    return layers, arch[-1]


def prepare_kernel_params(layers, in_dim, param_dtype=jnp.bfloat16, lane_pad=128):
    """Packs every layer's weight into a single slab aligned to the dense
    feature buffer: zero rows for not-yet-produced features and output columns
    placed at the layer's lane slot (so no in-kernel concat or lane shifts).

    Returns (params, layer_descrs, smem_flags, x_width, out_dim, out_pad).
    """
    k_pad = layers[-1]["w"].shape[0]           # final concatenated feature width
    has_fe = layers[0]["kind"] == "fe"
    x_width = layers[0]["w"].shape[0] if has_fe else k_pad

    params, smem_flags, descrs = [], [], []
    skip = None if has_fe else in_dim          # lanes [0:skip] currently hold features
    out_dim = out_pad = None

    for layer in layers:
        kind, w, b, pw = layer["kind"], layer["w"], layer["b"], layer["prelu"]
        k_in, n = w.shape

        if kind == "fe":
            slab = jnp.zeros((k_in, k_pad), jnp.float32).at[:, :n].set(w)
            off = 0
            new_skip = n
        elif kind == "concat":
            assert k_in == skip
            off = skip
            slab = (jnp.zeros((k_pad, k_pad), jnp.float32)
                    .at[:skip, off:off + n].set(w))
            new_skip = skip + n
        else:  # final
            assert k_in == k_pad and b is None
            out_dim = n
            out_pad = _round_up(n, lane_pad)   # lane-dense output stores
            off = 0
            slab = jnp.zeros((k_pad, out_pad), jnp.float32).at[:, :n].set(w)
            new_skip = skip

        params.append(slab.astype(param_dtype))
        smem_flags.append(False)

        if b is not None:
            bias = jnp.zeros((1, k_pad), jnp.float32).at[:, off:off + n].set(b)
            params.append(bias)                # bias stays f32 (added post-MXU)
            smem_flags.append(False)
        if pw is not None:
            params.append(pw.astype(jnp.float32))   # (1,) scalar -> SMEM
            smem_flags.append(True)

        descrs.append((kind, off, n, b is not None, pw is not None))
        skip = new_skip

    return params, tuple(descrs), tuple(smem_flags), x_width, out_dim, out_pad


# ------------------------------ wrapper --------------------------------------

def _tensorcores_per_chip():
    # v7x exposes 2 TensorCores per chip to one pallas_call (sharded via
    # dimension_semantics="parallel"); v5e / v6e have a single TensorCore.
    try:
        kind = jax.devices()[0].device_kind.lower()
    except Exception:
        return 1
    return 2 if "v7" in kind else 1


def densenet_forward(x, params, layer_descrs, param_smem, x_width, out_dim,
                     out_pad, activation, param_dtype=jnp.bfloat16,
                     max_block_rows=1024):
    B, in_dim = x.shape

    # Lane-pack the input into the dense feature width (zeros beyond in_dim).
    if x_width != in_dim:
        x = jnp.pad(x, ((0, 0), (0, x_width - in_dim)))

    # Batch tile: one block per TensorCore (grid=(1,) on v5e/v6e, two balanced
    # blocks on v7x), capped so very large batches still pipeline.
    n_cores = _tensorcores_per_chip()
    tm = _round_up(max(-(-B // n_cores), 8), 8)
    tm = min(tm, max_block_rows)
    b_pad = _round_up(B, tm)
    if b_pad != B:
        x = jnp.pad(x, ((0, b_pad - B), (0, 0)))
    grid = (b_pad // tm,)

    in_specs = [pl.BlockSpec((tm, x_width), lambda i: (i, 0))]
    for p, is_smem in zip(params, param_smem):
        if is_smem:
            in_specs.append(pl.BlockSpec(memory_space=pltpu.MemorySpace.SMEM))
        else:
            # Full-array block, same block every step -> stays VMEM-resident.
            in_specs.append(pl.BlockSpec(p.shape, lambda i: (0, 0)))
    out_specs = pl.BlockSpec((tm, out_pad), lambda i: (i, 0))

    # VMEM actually touched (default double-buffering on every operand) plus
    # slack -- far below the 64 MiB physical VMEM of a v7x TensorCore.
    param_bytes = sum(int(p.size) * p.dtype.itemsize for p in params)
    block_bytes = tm * x_width * x.dtype.itemsize + tm * out_pad * 4
    vmem_limit = int(min(max(4 * (param_bytes + block_bytes), 4 << 20), 64 << 20))

    # Advisory cost estimate for the XLA scheduler.
    flops = 0
    transcendentals = 0
    idx = 0
    for kind, _off, _n, has_bias, has_prelu in layer_descrs:
        k, n = params[idx].shape
        flops += 2 * b_pad * k * n
        idx += 1 + int(has_bias) + int(has_prelu)
        if kind != "final" and activation in ("tanh", "sigmoid"):
            transcendentals += b_pad * n
    bytes_accessed = (int(x.size) * x.dtype.itemsize + param_bytes
                      + b_pad * out_pad * 4)

    kernel = functools.partial(
        _densenet_kernel,
        layer_descrs=layer_descrs,
        activation=activation,
        compute_dtype=param_dtype,
    )
    out = pl.pallas_call(
        kernel,
        grid=grid,
        out_shape=jax.ShapeDtypeStruct((b_pad, out_pad), jnp.float32),
        in_specs=in_specs,
        out_specs=out_specs,
        compiler_params=pltpu.CompilerParams(
            dimension_semantics=("parallel",),   # megacore-shardable batch axis
            vmem_limit_bytes=vmem_limit,
        ),
        cost_estimate=pl.CostEstimate(
            flops=flops,
            transcendentals=transcendentals,
            bytes_accessed=bytes_accessed,
        ),
    )(x, *params)

    return out[:B, :out_dim]


# ---------------------------- pure-JAX reference -----------------------------

def densenet_reference(x, layers, activation, param_dtype=jnp.float32):
    """Faithful replay of the PyTorch module (real concatenation), with weights
    and dot inputs quantized to param_dtype exactly as the kernel does
    (accumulation stays f32)."""
    feat = x.astype(jnp.float32)
    for layer in layers:
        w = layer["w"].astype(param_dtype)
        y = jnp.dot(feat.astype(param_dtype), w,
                    preferred_element_type=jnp.float32)
        if layer["b"] is not None:
            y = y + layer["b"]
        if layer["kind"] == "final":
            return jnp.maximum(y, 0.0)
        pw = layer["prelu"][0] if layer["prelu"] is not None else None
        h = _apply_activation(activation, y, pw)
        feat = h if layer["kind"] == "fe" else jnp.concatenate([feat, h], axis=1)
    return None


# --------------------------------- main --------------------------------------

if __name__ == "__main__":
    key = jax.random.PRNGKey(0)
    k_param, k_x = jax.random.split(key)

    # DenseNet(net_arch=[32, 16, 16, 8], activation='tanh',
    #          feature_extractor=False, bias=True)
    net_arch = [32, 16, 16, 8]
    activation = "tanh"
    batch = 256

    layers, _ = build_densenet(
        k_param, net_arch, activation, feature_extractor=False, bias=True
    )

    # bf16 weights: the MXU on v5e/v6e/v7x is bf16-native; accumulation is f32.
    param_dtype = jnp.bfloat16
    params, descrs, smem, x_width, out_dim, out_pad = prepare_kernel_params(
        layers, in_dim=net_arch[0], param_dtype=param_dtype
    )

    x = jax.random.normal(k_x, (batch, net_arch[0]), jnp.float32)

    out = densenet_forward(
        x, params, descrs, smem, x_width, out_dim, out_pad, activation,
        param_dtype=param_dtype,
    )
    out = jax.block_until_ready(out)

    ref = densenet_reference(x, layers, activation, param_dtype=param_dtype)
    assert out.shape == (batch, out_dim), out.shape
    assert jnp.allclose(out, ref, atol=2e-4, rtol=2e-4), (
        "kernel mismatch vs reference, max abs err = "
        + str(float(jnp.max(jnp.abs(out - ref)))))

    print("KERNEL_OK")
</pallas_src>

<mosaic_0001>
module attributes {stable_mosaic.version = 11 : i64} {
  func.func @_densenet_kernel(%arg0: i32, %arg1: memref<256x64xf32, #tpu.memory_space<vmem>>, %arg2: memref<64x64xbf16, #tpu.memory_space<vmem>>, %arg3: memref<1x64xf32, #tpu.memory_space<vmem>>, %arg4: memref<64x64xbf16, #tpu.memory_space<vmem>>, %arg5: memref<1x64xf32, #tpu.memory_space<vmem>>, %arg6: memref<64x128xbf16, #tpu.memory_space<vmem>>, %arg7: memref<256x128xf32, #tpu.memory_space<vmem>>) attributes {dimension_semantics = [#tpu.dimension_semantics<parallel>], iteration_bounds = array<i64: 1>, scalar_prefetch = 0 : i64, scratch_operands = 0 : i64, tpu.core_type = #tpu.core_type<tc>, window_params = [{transform_indices = @transform_0, window_bounds = array<i64: 256, 64>}, {pipeline_mode = #tpu.pipeline_mode<synchronous>, transform_indices = @transform_1, window_bounds = array<i64: 64, 64>}, {pipeline_mode = #tpu.pipeline_mode<synchronous>, transform_indices = @transform_2, window_bounds = array<i64: 1, 64>}, {pipeline_mode = #tpu.pipeline_mode<synchronous>, transform_indices = @transform_3, window_bounds = array<i64: 64, 64>}, {pipeline_mode = #tpu.pipeline_mode<synchronous>, transform_indices = @transform_4, window_bounds = array<i64: 1, 64>}, {pipeline_mode = #tpu.pipeline_mode<synchronous>, transform_indices = @transform_5, window_bounds = array<i64: 64, 128>}, {transform_indices = @transform_6, window_bounds = array<i64: 256, 128>}]} {
    %c0 = arith.constant 0 : index
    %c0_0 = arith.constant 0 : index
    %0 = vector.load %arg1[%c0, %c0_0] : memref<256x64xf32, #tpu.memory_space<vmem>>, vector<256x64xf32>
    %1 = arith.truncf %0 : vector<256x64xf32> to vector<256x64xbf16>
    %c0_1 = arith.constant 0 : index
    %c0_2 = arith.constant 0 : index
    %2 = vector.load %arg2[%c0_1, %c0_2] : memref<64x64xbf16, #tpu.memory_space<vmem>>, vector<64x64xbf16>
    %cst = arith.constant dense<0.000000e+00> : vector<256x64xf32>
    %3 = tpu.matmul %1, %2, %cst {dimension_numbers = #tpu.dot_dimension_numbers<[1], [0], [0], [1], [0, 0, 1, 1], [], []>} : vector<256x64xbf16>, vector<64x64xbf16>, vector<256x64xf32> -> vector<256x64xf32>
    %c0_3 = arith.constant 0 : index
    %c0_4 = arith.constant 0 : index
    %4 = vector.load %arg3[%c0_3, %c0_4] : memref<1x64xf32, #tpu.memory_space<vmem>>, vector<1x64xf32>
    %5 = vector.broadcast %4 : vector<1x64xf32> to vector<256x64xf32>
    %6 = arith.addf %3, %5 : vector<256x64xf32>
    %7 = math.tanh %6 : vector<256x64xf32>
    %8 = arith.truncf %7 : vector<256x64xf32> to vector<256x64xbf16>
    %9 = tpu.iota {dimensions = array<i32: 1>} : vector<256x64xi32>
    %c32_i32 = arith.constant 32 : i32
    %10 = vector.broadcast %c32_i32 : i32 to vector<256x64xi32>
    %11 = arith.cmpi sge, %9, %10 : vector<256x64xi32>
    %c48_i32 = arith.constant 48 : i32
    %12 = vector.broadcast %c48_i32 : i32 to vector<256x64xi32>
    %13 = arith.cmpi slt, %9, %12 : vector<256x64xi32>
    %14 = arith.andi %11, %13 : vector<256x64xi1>
    %15 = arith.select %14, %8, %1 : vector<256x64xi1>, vector<256x64xbf16>
    %c0_5 = arith.constant 0 : index
    %c0_6 = arith.constant 0 : index
    %16 = vector.load %arg4[%c0_5, %c0_6] : memref<64x64xbf16, #tpu.memory_space<vmem>>, vector<64x64xbf16>
    %cst_7 = arith.constant dense<0.000000e+00> : vector<256x64xf32>
    %17 = tpu.matmul %15, %16, %cst_7 {dimension_numbers = #tpu.dot_dimension_numbers<[1], [0], [0], [1], [0, 0, 1, 1], [], []>} : vector<256x64xbf16>, vector<64x64xbf16>, vector<256x64xf32> -> vector<256x64xf32>
    %c0_8 = arith.constant 0 : index
    %c0_9 = arith.constant 0 : index
    %18 = vector.load %arg5[%c0_8, %c0_9] : memref<1x64xf32, #tpu.memory_space<vmem>>, vector<1x64xf32>
    %19 = vector.broadcast %18 : vector<1x64xf32> to vector<256x64xf32>
    %20 = arith.addf %17, %19 : vector<256x64xf32>
    %21 = math.tanh %20 : vector<256x64xf32>
    %22 = arith.truncf %21 : vector<256x64xf32> to vector<256x64xbf16>
    %23 = tpu.iota {dimensions = array<i32: 1>} : vector<256x64xi32>
    %c48_i32_10 = arith.constant 48 : i32
    %24 = vector.broadcast %c48_i32_10 : i32 to vector<256x64xi32>
    %25 = arith.cmpi sge, %23, %24 : vector<256x64xi32>
    %c64_i32 = arith.constant 64 : i32
    %26 = vector.broadcast %c64_i32 : i32 to vector<256x64xi32>
    %27 = arith.cmpi slt, %23, %26 : vector<256x64xi32>
    %28 = arith.andi %25, %27 : vector<256x64xi1>
    %29 = arith.select %28, %22, %15 : vector<256x64xi1>, vector<256x64xbf16>
    %c0_11 = arith.constant 0 : index
    %c0_12 = arith.constant 0 : index
    %30 = vector.load %arg6[%c0_11, %c0_12] : memref<64x128xbf16, #tpu.memory_space<vmem>>, vector<64x128xbf16>
    %cst_13 = arith.constant dense<0.000000e+00> : vector<256x128xf32>
    %31 = tpu.matmul %29, %30, %cst_13 {dimension_numbers = #tpu.dot_dimension_numbers<[1], [0], [0], [1], [0, 0, 1, 1], [], []>} : vector<256x64xbf16>, vector<64x128xbf16>, vector<256x128xf32> -> vector<256x128xf32>
    %cst_14 = arith.constant 0.000000e+00 : f32
    %32 = vector.broadcast %cst_14 : f32 to vector<256x128xf32>
    %33 = arith.maximumf %31, %32 : vector<256x128xf32>
    %c0_15 = arith.constant 0 : index
    %c0_16 = arith.constant 0 : index
    %34 = vector.load %arg7[%c0_15, %c0_16] : memref<256x128xf32, #tpu.memory_space<vmem>>, vector<256x128xf32>
    tpu.vector_store %arg7[%c0_15, %c0_16], %33 {strides = array<i32>} : memref<256x128xf32, #tpu.memory_space<vmem>>, vector<256x128xf32>,
    return
  }
  func.func @transform_0(%arg0: i32) -> (i32, i32) {
    %c0_i32 = arith.constant 0 : i32
    %c0_i32_0 = arith.constant 0 : i32
    return %arg0, %c0_i32 : i32, i32
  }
  func.func @transform_1(%arg0: i32) -> (i32, i32) {
    %c0_i32 = arith.constant 0 : i32
    %c0_i32_0 = arith.constant 0 : i32
    %c0_i32_1 = arith.constant 0 : i32
    return %c0_i32, %c0_i32_0 : i32, i32
  }
  func.func @transform_2(%arg0: i32) -> (i32, i32) {
    %c0_i32 = arith.constant 0 : i32
    %c0_i32_0 = arith.constant 0 : i32
    %c0_i32_1 = arith.constant 0 : i32
    return %c0_i32, %c0_i32_0 : i32, i32
  }
  func.func @transform_3(%arg0: i32) -> (i32, i32) {
    %c0_i32 = arith.constant 0 : i32
    %c0_i32_0 = arith.constant 0 : i32
    %c0_i32_1 = arith.constant 0 : i32
    return %c0_i32, %c0_i32_0 : i32, i32
  }
  func.func @transform_4(%arg0: i32) -> (i32, i32) {
    %c0_i32 = arith.constant 0 : i32
    %c0_i32_0 = arith.constant 0 : i32
    %c0_i32_1 = arith.constant 0 : i32
    return %c0_i32, %c0_i32_0 : i32, i32
  }
  func.func @transform_5(%arg0: i32) -> (i32, i32) {
    %c0_i32 = arith.constant 0 : i32
    %c0_i32_0 = arith.constant 0 : i32
    %c0_i32_1 = arith.constant 0 : i32
    return %c0_i32, %c0_i32_0 : i32, i32
  }
  func.func @transform_6(%arg0: i32) -> (i32, i32) {
    %c0_i32 = arith.constant 0 : i32
    %c0_i32_0 = arith.constant 0 : i32
    return %arg0, %c0_i32 : i32, i32
  }
}

</mosaic_0001>

<bundles_post_ra>
// kernel: tpu_custom_call.1
= control target key start
LH: loop header
LB: loop body
LE: loop exit
PB: predicated region body
PF: predicated region fallthrough
CT: control target
= control target key end

     0   :  { %vm114_vm0 = vcmask 523264   ;;  %s1996_s0 = inlined_call_operand.vmem [shape: f32[256,64], index: 0, kind: input, shape index: {}]   ;;  %s1997_s1 = inlined_call_operand.vmem [shape: bf16[64,64], index: 1, kind: input, shape index: {}]   ;;  %s1998_s2 = inlined_call_operand.vmem [shape: f32[1,64], index: 2, kind: input, shape index: {}]   ;;  %s1999_s3 = inlined_call_operand.vmem [shape: bf16[64,64], index: 3, kind: input, shape index: {}]   ;;  %s2000_s4 = inlined_call_operand.vmem [shape: f32[1,64], index: 4, kind: input, shape index: {}]   ;;  %s2001_s5 = inlined_call_operand.vmem [shape: bf16[64,128], index: 5, kind: input, shape index: {}]   ;;  %s2002_s6 = inlined_call_operand.hbm [shape: f32[256,128], index: 6, kind: output, shape index: {}]  }
   0x1   :  { %v1297_v0 = vld [vmem:[%s1997_s1 + $0x18] sm:$0xff]   ;;  %v1298_v1 = vld [vmem:[%s1997_s1 + $0x10] sm:$0xff]   ;;  %v1299_v2 = vld [vmem:[%s1997_s1 + $0x8] sm:$0xff]  }
   0x2   :  { %1165 = vmatprep.subr.bf16.mxu0 %v1297_v0  ;;  %1285 = vmatprep.subr.bf16.mxu1 %v1297_v0  ;;  %v27_v3 = vld [vmem:[%s1996_s0] sm:$0xff]  ;;  %v28_v4 = vld [vmem:[%s1996_s0 + $0x8] sm:$0xff]  ;;  %v29_v10 = vld [vmem:[%s1996_s0 + $0x10] sm:$0xff] }
   0x3   :  { %1166 = vmatpush3.bf16.msra.mxu0 %v1297_v0  ;;  %1289 = vmatpush3.bf16.msra.mxu1 %v1297_v0  ;;  %v1513_v5 = vpack.c.bf16 %v28_v4, %v27_v3  ;;  %v1300_v6 = vld [vmem:[%s1997_s1] sm:$0xff]   ;;  %v44_v8 = vld [vmem:[%s1996_s0 + $0x88] sm:$0xff]  ;;  %v30_v11 = vld [vmem:[%s1996_s0 + $0x18] sm:$0xff] }
   0x4   :  { %1167 = vmatprep.subr.bf16.mxu0 %v1298_v1  ;;  %1286 = vmatprep.subr.bf16.mxu1 %v1298_v1  ;;  %v43_v7 = vld [vmem:[%s1996_s0 + $0x80] sm:$0xff]  ;;  %v32_v13 = vld [vmem:[%s1996_s0 + $0x28] sm:$0xff]  ;;  %v45_v14 = vld [vmem:[%s1996_s0 + $0x90] sm:$0xff]  ;;  %v1554_v18 = vpack.c.bf16 %v30_v11, %v29_v10 }
   0x5   :  { %1173 = vmatprep.mubr.msk.bf16.mxu0 %vm114_vm0, %v1513_v5  ;;  %v1526_v9 = vpack.c.bf16 %v44_v8, %v43_v7  ;;  %v31_v12 = vld [vmem:[%s1996_s0 + $0x20] sm:$0xff]  ;;  %v46_v15 = vld [vmem:[%s1996_s0 + $0x98] sm:$0xff]  ;;  %v48_v17 = vld [vmem:[%s1996_s0 + $0xa8] sm:$0xff] }
   0x6   :  { %v47_v16 = vld [vmem:[%s1996_s0 + $0xa0] sm:$0xff]  ;;  %v1556_v19 = vpack.c.bf16 %v32_v13, %v31_v12  ;;  %v1558_v20 = vpack.c.bf16 %v46_v15, %v45_v14  ;;  %v1301_v21 = vld [vmem:[%s1999_s3 + $0x18] sm:$0xff]   ;;  %v33_v23 = vld [vmem:[%s1996_s0 + $0x30] sm:$0xff] }
   0x7   :  { %1168 = vmatpush3.bf16.msra.mxu0 %v1298_v1  ;;  %1290 = vmatpush3.bf16.msra.mxu1 %v1298_v1  ;;  %v1563_v22 = vpack.c.bf16 %v48_v17, %v47_v16  ;;  %v34_v24 = vld [vmem:[%s1996_s0 + $0x38] sm:$0xff]  ;;  %v35_v25 = vld [vmem:[%s1996_s0 + $0x40] sm:$0xff]  ;;  %v36_v26 = vld [vmem:[%s1996_s0 + $0x48] sm:$0xff] }
   0x8   :  { %1169 = vmatprep.subr.bf16.mxu0 %v1299_v2  ;;  %1287 = vmatprep.subr.bf16.mxu1 %v1299_v2  ;;  %v49_v27 = vld [vmem:[%s1996_s0 + $0xb0] sm:$0xff]  ;;  %v50_v28 = vld [vmem:[%s1996_s0 + $0xb8] sm:$0xff] }
   0x9   :  { %1189 = vmatprep.mubr.msk.bf16.mxu1 %vm114_vm0, %v1526_v9 }
   0xb   :  { %1170 = vmatpush3.bf16.msra.mxu0 %v1299_v2  ;;  %1291 = vmatpush3.bf16.msra.mxu1 %v1299_v2 }
   0xc   :  { %1171 = vmatprep.subr.bf16.mxu0 %v1300_v6  ;;  %1288 = vmatprep.subr.bf16.mxu1 %v1300_v6 }
   0xf   :  { %1172 = vmatpush3.bf16.msra.mxu0 %v1300_v6  ;;  %1292 = vmatpush3.bf16.msra.mxu1 %v1300_v6 }
  0x10   :  { %1205 = vmatprep.subr.bf16.mxu1 %v1301_v21 }
  0x12   :  { %1174 = vmatmul.mubr.msk.bf16.vlgmr.msra.gmra.mxu0 %vm114_vm0, %v1554_v18  ;;  %1190 = vmatmul.mubr.msk.bf16.vlgmr.msra.gmra.mxu1 %vm114_vm0, %v1558_v20 }
  0x13   :  { %1177 = vmatprep.mubr.msk.bf16.mxu0 %vm114_vm0, %v1556_v19  ;;  %1193 = vmatprep.mubr.msk.bf16.mxu1 %vm114_vm0, %v1563_v22 }
  0x14   :  { %1206 = vmatpush3.bf16.msra.mxu1 %v1301_v21 }
  0x15   :  { %11 = vsyncpa [#allocation3], 0  ;;  %v51_v29 = vld [vmem:[%s1996_s0 + $0xc0] sm:$0xff]  ;;  %v52_v30 = vld [vmem:[%s1996_s0 + $0xc8] sm:$0xff]  ;;  %v1597_v31 = vpack.c.bf16 %v34_v24, %v33_v23  ;;  %v1599_v32 = vpack.c.bf16 %v36_v26, %v35_v25  ;;  %v1601_v33 = vpack.c.bf16 %v50_v28, %v49_v27  ;;  %v372_v58 = vlaneseq }
  0x16   :  { %v1603_v34 = vpack.c.bf16 %v52_v30, %v51_v29  ;;  %v37_v35 = vld [vmem:[%s1996_s0 + $0x50] sm:$0xff]  ;;  %v38_v36 = vld [vmem:[%s1996_s0 + $0x58] sm:$0xff]  ;;  %v39_v37 = vld [vmem:[%s1996_s0 + $0x60] sm:$0xff]  ;;  %v1459_v30 = vmov 0  }
  0x17   :  { %v40_v38 = vld [vmem:[%s1996_s0 + $0x68] sm:$0xff]  ;;  %v53_v39 = vld [vmem:[%s1996_s0 + $0xd0] sm:$0xff]  ;;  %v54_v40 = vld [vmem:[%s1996_s0 + $0xd8] sm:$0xff]  ;;  %v1637_v43 = vpack.c.bf16 %v38_v36, %v37_v35  ;;  %v1693_v63 = vand.u32 127, %v372_v58  ;;  %v1709_v15 = vshrl.u32 %v372_v58, 7 }
  0x18   :  { %v55_v41 = vld [vmem:[%s1996_s0 + $0xe0] sm:$0xff]  ;;  %v56_v42 = vld [vmem:[%s1996_s0 + $0xe8] sm:$0xff]  ;;  %v1639_v44 = vpack.c.bf16 %v40_v38, %v39_v37  ;;  %v1641_v45 = vpack.c.bf16 %v54_v40, %v53_v39  ;;  %v41_v47 = vld [vmem:[%s1996_s0 + $0x70] sm:$0xff] }
  0x19   :  { %v1643_v46 = vpack.c.bf16 %v56_v42, %v55_v41  ;;  %v42_v48 = vld [vmem:[%s1996_s0 + $0x78] sm:$0xff]  ;;  %v57_v49 = vld [vmem:[%s1996_s0 + $0xf0] sm:$0xff]  ;;  %v1303_v54 = vld [vmem:[%s1999_s3 + $0x8] sm:$0xff]   ;;  %vm374_vm1 = vcmp.ge.s32.totalorder %v1693_v63, 32  ;;  %vm375_vm2 = vcmp.lt.s32.totalorder %v1693_v63, 48  ;;  %v381_v27 = vsub.s32 0, %v1709_v15 }
  0x1a   :  { %1178 = vmatmul.mubr.msk.bf16.gmra.mxu0 %vm114_vm0, %v1597_v31  ;;  %1194 = vmatmul.mubr.msk.bf16.gmra.mxu1 %vm114_vm0, %v1601_v33  ;;  %v58_v50 = vld [vmem:[%s1996_s0 + $0xf8] sm:$0xff]  ;;  %v1665_v51 = vpack.c.bf16 %v42_v48, %v41_v47  ;;  %v1302_v53 = vld [vmem:[%s1999_s3 + $0x10] sm:$0xff]   ;;  %v1304_v55 = vld [vmem:[%s1999_s3] sm:$0xff]   ;;  %vm696_vm6 = vcmp.ge.s32.totalorder %v1693_v63, 48  ;;  %vm697_vm7 = vcmp.lt.s32.totalorder %v1693_v63, 64 }
  0x1b   :  { %1181 = vmatprep.mubr.msk.bf16.mxu0 %vm114_vm0, %v1599_v32  ;;  %1197 = vmatprep.mubr.msk.bf16.mxu1 %vm114_vm0, %v1603_v34  ;;  %v1667_v52 = vpack.c.bf16 %v58_v50, %v57_v49  ;;  %v1305_v56 = vld [vmem:[%s2001_s5 + $0x18] sm:$0xff]   ;;  %v1688_v57 = vld [vmem:[%s1998_s2] ss:$0 sm:$0xff]  ;;  %vm1705_vm3 = vmand %vm374_vm1, %vm375_vm2 }
  0x1c   :  { %1207 = vmatprep.subr.bf16.mxu1 %v1302_v53  ;;  %1245 = vmatprep.subr.bf16.mxu0 %v1305_v56  ;;  %vm377_vm4 = vmpackc.low %vm1705_vm3, %vm1705_vm3 }
  0x1d   :  { %1208 = vmatpush3.bf16.msra.mxu1 %v1302_v53  ;;  %1246 = vmatpush3.bf16.msra.mxu0 %v1305_v56  ;;  %v378_v35 = vsel %vm377_vm4, 65537, %v1459_v30  ;;  %vm698_vm8 = vmand %vm696_vm6, %vm697_vm7 }
  0x1e   :  { %1209 = vmatprep.subr.bf16.mxu1 %v1303_v54  ;;  %v1728_v40 = vrot.slane %v378_v35, %v381_v27  ;;  %vm699_vm9 = vmpackc.low %vm698_vm8, %vm698_vm8 }
  0x20   :  { %vm383_vm5 = vcmp.ne.s16.totalorder %v1728_v40, 0  ;;  %v1887_v40 = vld [vmem:[%s2000_s4] ss:$0 sm:$0xff]  ;;  %s1460_s4 = smov [#allocation2]  }
  0x21   :  { %1210 = vmatpush3.bf16.msra.mxu1 %v1303_v54 }
  0x22   :  { %1182 = vmatmul.mubr.msk.bf16.gmra.mxu0 %vm114_vm0, %v1637_v43  ;;  %1198 = vmatmul.mubr.msk.bf16.gmra.mxu1 %vm114_vm0, %v1641_v45 }
  0x23   :  { %1185 = vmatprep.mubr.msk.bf16.mxu0 %vm114_vm0, %v1639_v44  ;;  %1201 = vmatprep.mubr.msk.bf16.mxu1 %vm114_vm0, %v1643_v46 }
  0x24   :  { %1211 = vmatprep.subr.bf16.mxu1 %v1304_v55 }
  0x25   :  { %1212 = vmatpush3.bf16.msra.mxu1 %v1304_v55 }
  0x2a   :  { %1186 = vmatmul.mubr.msk.bf16.gmra.mxu0 %vm114_vm0, %v1665_v51  ;;  %1202 = vmatmul.mubr.msk.bf16.gmra.mxu1 %vm114_vm0, %v1667_v52 }
  0xd2   :  { %v1175_v59 = vpop.f32.mrf.mxu0  ;;  %v1690_v60 = vpop.f32.mrf.mxu1 }
  0xd3   :  { %v206_v61 = vadd.f32 %v1175_v59, %v1688_v57 }
  0xd4   :  { %v197_v62 = vpop.f32.mrf.mxu0  ;;  %v261_v0 = vpop.f32.mrf.mxu1 }
  0xd5   :  { %v198_v1 = vadd.f32 %v1688_v57, %v197_v62  ;;  %1309 = vtanh.f32 %v206_v61  ;;  %v262_v61 = vadd.f32 %v1688_v57, %v261_v0 }
  0xd6   :  { %v1176_v2 = vpop.f32.mrf.mxu0  ;;  %v1697_v4 = vpop.f32.mrf.mxu1 }
  0xd7   :  { %v209_v3 = vadd.f32 %v1176_v2, %v1688_v57 }
  0xd8   :  { %v200_v6 = vpop.f32.mrf.mxu0  ;;  %v264_v8 = vpop.f32.mrf.mxu1 }
  0xd9   :  { %1311 = vtanh.f32 %v209_v3  ;;  %v201_v7 = vadd.f32 %v1688_v57, %v200_v6 }
  0xda   :  { %1313 = vtanh.f32 %v198_v1  ;;  %v1179_v10 = vpop.f32.mrf.mxu0  ;;  %v1702_v11 = vpop.f32.mrf.mxu1  ;;  %v265_v1 = vadd.f32 %v1688_v57, %v264_v8 }
  0xdb   :  { %1315 = vtanh.f32 %v201_v7  ;;  %v222_v12 = vadd.f32 %v1179_v10, %v1688_v57 }
  0xdc   :  { %v213_v13 = vpop.f32.mrf.mxu0  ;;  %v1711_v16 = vpop.f32.mrf.mxu1 }
  0xdd   :  { %v214_v17 = vadd.f32 %v1688_v57, %v213_v13  ;;  %1317 = vtanh.f32 %v222_v12 }
  0xde   :  { %v1180_v21 = vpop.f32.mrf.mxu0  ;;  %v1718_v24 = vpop.f32.mrf.mxu1 }
  0xdf   :  { %v225_v23 = vadd.f32 %v1180_v21, %v1688_v57 }
  0xe0   :  { %v216_v25 = vpop.f32.mrf.mxu0  ;;  %v280_v28 = vpop.f32.mrf.mxu1 }
  0xe1   :  { %1319 = vtanh.f32 %v225_v23  ;;  %v217_v26 = vadd.f32 %v1688_v57, %v216_v25  ;;  %v270_v23 = vadd.f32 %v1690_v60, %v1688_v57 }
  0xe2   :  { %1321 = vtanh.f32 %v214_v17  ;;  %v1183_v29 = vpop.f32.mrf.mxu0  ;;  %v1724_v38 = vpop.f32.mrf.mxu1 }
  0xe3   :  { %1323 = vtanh.f32 %v217_v26  ;;  %v238_v36 = vadd.f32 %v1183_v29, %v1688_v57  ;;  %v1310_v39 = vpop.eup %1309  ;;  %v278_v29 = vadd.f32 %v1688_v57, %v1711_v16 }
  0xe4   :  { %v229_v37 = vpop.f32.mrf.mxu0  ;;  %v293_v55 = vpop.f32.mrf.mxu1 }
  0xe5   :  { %v230_v42 = vadd.f32 %v1688_v57, %v229_v37  ;;  %1325 = vtanh.f32 %v238_v36  ;;  %v281_v36 = vadd.f32 %v1688_v57, %v280_v28  ;;  %v273_v37 = vadd.f32 %v1697_v4, %v1688_v57 }
  0xe6   :  { %v1312_v41 = vpop.eup %1311  ;;  %v1184_v47 = vpop.f32.mrf.mxu0 }
  0xe7   :  { %v1314_v48 = vpop.eup %1313  ;;  %v241_v49 = vadd.f32 %v1184_v47, %v1688_v57  ;;  %v357_v54 = vpack.c.bf16 %v1312_v41, %v1310_v39  ;;  %v1749_v0 = vpop.f32.mrf.mxu1  ;;  %v286_v47 = vadd.f32 %v1702_v11, %v1688_v57 }
  0xe8   :  { %v1316_v50 = vpop.eup %1315  ;;  %v232_v53 = vpop.f32.mrf.mxu0 }
  0xe9   :  { %1327 = vtanh.f32 %v241_v49  ;;  %v233_v56 = vadd.f32 %v1688_v57, %v232_v53  ;;  %v356_v58 = vpack.c.bf16 %v1316_v50, %v1314_v48  ;;  %v1747_v6 = vsel %vm383_vm5, %v357_v54, %v1554_v18  ;;  %v296_v21 = vpop.f32.mrf.mxu1 }
  0xea   :  { %1329 = vtanh.f32 %v230_v42  ;;  %v1187_v59 = vpop.f32.mrf.mxu0  ;;  %v1318_v7 = vpop.eup %1317  ;;  %v297_v53 = vadd.f32 %v1688_v57, %v296_v21 }
  0xeb   :  { %1331 = vtanh.f32 %v233_v56  ;;  %v1738_v62 = vsel %vm383_vm5, %v356_v58, %v1513_v5  ;;  %v254_v2 = vadd.f32 %v1187_v59, %v1688_v57  ;;  %v1203_v16 = vpop.f32.mrf.mxu1  ;;  %v289_v56 = vadd.f32 %v1718_v24, %v1688_v57 }
  0xec   :  { %v245_v3 = vpop.f32.mrf.mxu0  ;;  %1213 = vmatprep.mubr.msk.bf16.mxu1 %vm114_vm0, %v1738_v62  ;;  %1333 = vtanh.f32 %v262_v61 }
  0xed   :  { %1214 = vmatmul.mubr.msk.bf16.vlgmr.msra.gmra.mxu1 %vm114_vm0, %v1747_v6  ;;  %v246_v8 = vadd.f32 %v1688_v57, %v245_v3  ;;  %1335 = vtanh.f32 %v265_v1  ;;  %v309_v42 = vpop.f32.mrf.mxu1  ;;  %v302_v3 = vadd.f32 %v1724_v38, %v1688_v57  ;;  %v305_v38 = vadd.f32 %v1749_v0, %v1688_v57 }
  0xee   :  { %v1320_v5 = vpop.eup %1319  ;;  %v1188_v10 = vpop.f32.mrf.mxu0  ;;  %1337 = vtanh.f32 %v254_v2 }
  0xef   :  { %v1322_v12 = vpop.eup %1321  ;;  %v257_v13 = vadd.f32 %v1188_v10, %v1688_v57  ;;  %v359_v18 = vpack.c.bf16 %v1320_v5, %v1318_v7  ;;  %v310_v5 = vadd.f32 %v1688_v57, %v309_v42 }
  0xf0   :  { %v1324_v14 = vpop.eup %1323  ;;  %v248_v17 = vpop.f32.mrf.mxu0 }
  0xf1   :  { %1339 = vtanh.f32 %v257_v13  ;;  %v249_v25 = vadd.f32 %v1688_v57, %v248_v17  ;;  %v358_v26 = vpack.c.bf16 %v1324_v14, %v1322_v12  ;;  %v1773_v60 = vsel %vm383_vm5, %v359_v18, %v1597_v31 }
  0xf2   :  { %1341 = vtanh.f32 %v246_v8  ;;  %v1326_v39 = vpop.eup %1325  ;;  %v294_v31 = vadd.f32 %v1688_v57, %v293_v55  ;;  %v1204_v55 = vpop.f32.mrf.mxu1 }
  0xf3   :  { %1343 = vtanh.f32 %v249_v25  ;;  %v1763_v35 = vsel %vm383_vm5, %v358_v26, %v1556_v19  ;;  %v321_v26 = vadd.f32 %v1204_v55, %v1688_v57 }
  0xf4   :  { %1217 = vmatprep.mubr.msk.bf16.mxu1 %vm114_vm0, %v1763_v35  ;;  %1345 = vtanh.f32 %v270_v23  ;;  %v312_v2 = vpop.f32.mrf.mxu1  ;;  %v318_v23 = vadd.f32 %v1203_v16, %v1688_v57 }
  0xf5   :  { %1218 = vmatmul.mubr.msk.bf16.gmra.mxu1 %vm114_vm0, %v1773_v60  ;;  %1347 = vtanh.f32 %v278_v29  ;;  %v313_v13 = vadd.f32 %v1688_v57, %v312_v2 }
  0xf6   :  { %v1328_v19 = vpop.eup %1327  ;;  %1349 = vtanh.f32 %v281_v36 }
  0xf7   :  { %v1330_v28 = vpop.eup %1329  ;;  %1351 = vtanh.f32 %v273_v37  ;;  %v361_v4 = vpack.c.bf16 %v1328_v19, %v1326_v39 }
  0xf8   :  { %v1332_v41 = vpop.eup %1331  ;;  %1353 = vtanh.f32 %v286_v47 }
  0xf9   :  { %v360_v48 = vpack.c.bf16 %v1332_v41, %v1330_v28  ;;  %v1334_v49 = vpop.eup %1333  ;;  %v1793_v11 = vsel %vm383_vm5, %v361_v4, %v1637_v43  ;;  %1355 = vtanh.f32 %v294_v31 }
  0xfa   :  { %v1336_v54 = vpop.eup %1335  ;;  %1357 = vtanh.f32 %v297_v53 }
  0xfb   :  { %v1783_v50 = vsel %vm383_vm5, %v360_v48, %v1599_v32  ;;  %v1338_v58 = vpop.eup %1337  ;;  %v364_v61 = vpack.c.bf16 %v1336_v54, %v1334_v49  ;;  %1359 = vtanh.f32 %v289_v56 }
  0xfc   :  { %1221 = vmatprep.mubr.msk.bf16.mxu1 %vm114_vm0, %v1783_v50  ;;  %1361 = vtanh.f32 %v302_v3 }
  0xfd   :  { %1222 = vmatmul.mubr.msk.bf16.gmra.mxu1 %vm114_vm0, %v1793_v11  ;;  %v1808_v12 = vsel %vm383_vm5, %v364_v61, %v1526_v9  ;;  %1363 = vtanh.f32 %v310_v5 }
  0xfe   :  { %v1340_v32 = vpop.eup %1339  ;;  %1365 = vtanh.f32 %v313_v13 }
  0xff   :  { %v1342_v59 = vpop.eup %1341  ;;  %v363_v1 = vpack.c.bf16 %v1340_v32, %v1338_v58  ;;  %1367 = vtanh.f32 %v305_v38 }
 0x100   :  { %v1344_v24 = vpop.eup %1343  ;;  %1369 = vtanh.f32 %v318_v23 }
 0x101   :  { %v362_v43 = vpack.c.bf16 %v1344_v24, %v1342_v59  ;;  %v1346_v7 = vpop.eup %1345  ;;  %v1818_v17 = vsel %vm383_vm5, %v363_v1, %v1665_v51  ;;  %1371 = vtanh.f32 %v321_v26 }
 0x102   :  { %v1348_v8 = vpop.eup %1347 }
 0x103   :  { %v1803_v10 = vsel %vm383_vm5, %v362_v43, %v1639_v44  ;;  %v1350_v14 = vpop.eup %1349 }
 0x104   :  { %1225 = vmatprep.mubr.msk.bf16.mxu1 %vm114_vm0, %v1803_v10  ;;  %v1352_v44 = vpop.eup %1351  ;;  %v366_v9 = vpack.c.bf16 %v1350_v14, %v1348_v8  ;;  %v700_v8 = vsel %vm699_vm9, 65537, %v1459_v30 }
 0x105   :  { %1226 = vmatmul.mubr.msk.bf16.gmra.mxu1 %vm114_vm0, %v1818_v17  ;;  %v365_v0 = vpack.c.bf16 %v1352_v44, %v1346_v7  ;;  %v1354_v18 = vpop.eup %1353  ;;  %v1903_v44 = vrot.slane %v700_v8, %v381_v27 }
 0x106   :  { %1229 = vmatprep.mubr.msk.bf16.mxu1 %vm114_vm0, %v1808_v12  ;;  %v1356_v21 = vpop.eup %1355  ;;  %v1828_v51 = vsel %vm383_vm5, %v366_v9, %v1563_v22 }
 0x107   :  { %v1358_v25 = vpop.eup %1357  ;;  %v1834_v29 = vsel %vm383_vm5, %v365_v0, %v1558_v20  ;;  %vm705_vm10 = vcmp.ne.s16.totalorder %v1903_v44, 0 }
 0x108   :  { %v1360_v36 = vpop.eup %1359  ;;  %v368_v37 = vpack.c.bf16 %v1358_v25, %v1356_v21 }
 0x109   :  { %v367_v22 = vpack.c.bf16 %v1360_v36, %v1354_v18  ;;  %v1362_v16 = vpop.eup %1361 }
 0x10a   :  { %v1364_v39 = vpop.eup %1363  ;;  %v1843_v57 = vsel %vm383_vm5, %v368_v37, %v1603_v34 }
 0x10b   :  { %v1366_v20 = vpop.eup %1365  ;;  %v1848_v19 = vsel %vm383_vm5, %v367_v22, %v1601_v33 }
 0x10c   :  { %v1368_v28 = vpop.eup %1367  ;;  %v370_v41 = vpack.c.bf16 %v1366_v20, %v1364_v39 }
 0x10d   :  { %1230 = vmatmul.mubr.msk.bf16.gmra.mxu1 %vm114_vm0, %v1834_v29  ;;  %v369_v4 = vpack.c.bf16 %v1368_v28, %v1362_v16  ;;  %v1370_v42 = vpop.eup %1369 }
 0x10e   :  { %1233 = vmatprep.mubr.msk.bf16.mxu1 %vm114_vm0, %v1828_v51  ;;  %v1857_v34 = vsel %vm383_vm5, %v370_v41, %v1643_v46  ;;  %v1372_v47 = vpop.eup %1371  ;;  %v1307_v46 = vld [vmem:[%s2001_s5 + $0x8] sm:$0xff]  }
 0x10f   :  { %v1862_v33 = vsel %vm383_vm5, %v369_v4, %v1641_v45  ;;  %v371_v48 = vpack.c.bf16 %v1372_v47, %v1370_v42  ;;  %v1306_v45 = vld [vmem:[%s2001_s5 + $0x10] sm:$0xff]  }
 0x110   :  { %1247 = vmatprep.subr.bf16.mxu0 %v1306_v45 }
 0x111   :  { %v1871_v31 = vsel %vm383_vm5, %v371_v48, %v1667_v52  ;;  %1248 = vmatpush3.bf16.msra.mxu0 %v1306_v45  ;;  %v1308_v52 = vld [vmem:[%s2001_s5] sm:$0xff]   ;;  %s1032_s5 = sshll.u32 %s1460_s4, 4  ;;  %s1033_s5 = int_to_ptr.vmem [resolvable:$true] %s1032_s5 }
 0x112   :  { %1249 = vmatprep.subr.bf16.mxu0 %v1307_v46  ;;  %s1437_s11 = scalar_lea.vmem %s1033_s5, 4096  ;;  %p1442_p1 = scmp.lt.s32.totalorder %s1033_s5, %s1033_s5 }
 0x113   :  { %p1438_p0 = scmp.ne.s32.totalorder %s1033_s5, %s1437_s11  ;;  %p1443_p2 = scmp.lt.s32.totalorder %s1437_s11, %s1437_s11 }
 0x115   :  { %1234 = vmatmul.mubr.msk.bf16.gmra.mxu1 %vm114_vm0, %v1848_v19  ;;  %1250 = vmatpush3.bf16.msra.mxu0 %v1307_v46  ;;  %p1444_p3 = por %p1443_p2, %p1442_p1 }
 0x116   :  { %1237 = vmatprep.mubr.msk.bf16.mxu1 %vm114_vm0, %v1843_v57  ;;  %1251 = vmatprep.subr.bf16.mxu0 %v1308_v52 }
 0x117   :  { %p1445_p4 = pnand %p1444_p3, %p1438_p0 }
 0x119   :  { %1252 = vmatpush3.bf16.msra.mxu0 %v1308_v52 }
 0x11d   :  { %1238 = vmatmul.mubr.msk.bf16.gmra.mxu1 %vm114_vm0, %v1862_v33 }
 0x11e   :  { %1241 = vmatprep.mubr.msk.bf16.mxu1 %vm114_vm0, %v1857_v34 }
 0x125   :  { %1242 = vmatmul.mubr.msk.bf16.gmra.mxu1 %vm114_vm0, %v1871_v31 }
 0x1ad   :  { %v1215_v49 = vpop.f32.mrf.mxu1 }
 0x1ae   :  { %v530_v53 = vadd.f32 %v1215_v49, %v1887_v40 }
 0x1af   :  { %v521_v54 = vpop.f32.mrf.mxu1 }
 0x1b0   :  { %v522_v56 = vadd.f32 %v1887_v40, %v521_v54  ;;  %1373 = vtanh.f32 %v530_v53 }
 0x1b1   :  { %v1216_v55 = vpop.f32.mrf.mxu1 }
 0x1b2   :  { %v533_v58 = vadd.f32 %v1216_v55, %v1887_v40 }
 0x1b3   :  { %v524_v32 = vpop.f32.mrf.mxu1 }
 0x1b4   :  { %1375 = vtanh.f32 %v533_v58  ;;  %v525_v59 = vadd.f32 %v1887_v40, %v524_v32 }
 0x1b5   :  { %1377 = vtanh.f32 %v522_v56  ;;  %v1219_v61 = vpop.f32.mrf.mxu1 }
 0x1b6   :  { %1379 = vtanh.f32 %v525_v59  ;;  %v546_v24 = vadd.f32 %v1219_v61, %v1887_v40 }
 0x1b7   :  { %v537_v1 = vpop.f32.mrf.mxu1 }
 0x1b8   :  { %v538_v2 = vadd.f32 %v1887_v40, %v537_v1  ;;  %1381 = vtanh.f32 %v546_v24 }
 0x1b9   :  { %v1220_v3 = vpop.f32.mrf.mxu1 }
 0x1ba   :  { %v549_v43 = vadd.f32 %v1220_v3, %v1887_v40 }
 0x1bb   :  { %v540_v7 = vpop.f32.mrf.mxu1 }
 0x1bc   :  { %1383 = vtanh.f32 %v549_v43  ;;  %v541_v5 = vadd.f32 %v1887_v40, %v540_v7 }
 0x1bd   :  { %1385 = vtanh.f32 %v538_v2  ;;  %v1223_v63 = vpop.f32.mrf.mxu1  ;;  %v1374_v38 = vpop.eup %1373 }
 0x1be   :  { %1387 = vtanh.f32 %v541_v5  ;;  %v562_v13 = vadd.f32 %v1223_v63, %v1887_v40 }
 0x1bf   :  { %v553_v14 = vpop.f32.mrf.mxu1 }
 0x1c0   :  { %v554_v0 = vadd.f32 %v1887_v40, %v553_v14  ;;  %1389 = vtanh.f32 %v562_v13 }
 0x1c1   :  { %v1376_v9 = vpop.eup %1375  ;;  %v1224_v18 = vpop.f32.mrf.mxu1 }
 0x1c2   :  { %v1378_v21 = vpop.eup %1377  ;;  %v565_v23 = vadd.f32 %v1224_v18, %v1887_v40  ;;  %v681_v30 = vpack.c.bf16 %v1376_v9, %v1374_v38 }
 0x1c3   :  { %v1380_v25 = vpop.eup %1379  ;;  %v556_v26 = vpop.f32.mrf.mxu1 }
 0x1c4   :  { %1391 = vtanh.f32 %v565_v23  ;;  %v557_v36 = vadd.f32 %v1887_v40, %v556_v26  ;;  %v680_v37 = vpack.c.bf16 %v1380_v25, %v1378_v21  ;;  %v707_v39 = vsel %vm705_vm10, %v681_v30, %v1747_v6 }
 0x1c5   :  { %1393 = vtanh.f32 %v554_v0  ;;  %v1227_v15 = vpop.f32.mrf.mxu1  ;;  %v1382_v20 = vpop.eup %1381 }
 0x1c6   :  { %1395 = vtanh.f32 %v557_v36  ;;  %v706_v27 = vsel %vm705_vm10, %v680_v37, %v1738_v62  ;;  %v578_v22 = vadd.f32 %v1227_v15, %v1887_v40 }
 0x1c7   :  { %v569_v16 = vpop.f32.mrf.mxu1  ;;  %1253 = vmatprep.mubr.msk.bf16.mxu0 %vm114_vm0, %v706_v27 }
 0x1c8   :  { %1254 = vmatmul.mubr.msk.bf16.vlgmr.msra.gmra.mxu0 %vm114_vm0, %v707_v39  ;;  %v570_v41 = vadd.f32 %v1887_v40, %v569_v16  ;;  %1397 = vtanh.f32 %v578_v22 }
 0x1c9   :  { %v1384_v28 = vpop.eup %1383  ;;  %v1228_v4 = vpop.f32.mrf.mxu1 }
 0x1ca   :  { %v1386_v42 = vpop.eup %1385  ;;  %v581_v47 = vadd.f32 %v1228_v4, %v1887_v40  ;;  %v683_v45 = vpack.c.bf16 %v1384_v28, %v1382_v20 }
 0x1cb   :  { %v1388_v62 = vpop.eup %1387  ;;  %v572_v48 = vpop.f32.mrf.mxu1 }
 0x1cc   :  { %1399 = vtanh.f32 %v581_v47  ;;  %v573_v46 = vadd.f32 %v1887_v40, %v572_v48  ;;  %v682_v52 = vpack.c.bf16 %v1388_v62, %v1386_v42  ;;  %v709_v56 = vsel %vm705_vm10, %v683_v45, %v1773_v60 }
 0x1cd   :  { %1401 = vtanh.f32 %v570_v41  ;;  %v1231_v6 = vpop.f32.mrf.mxu1  ;;  %v1390_v55 = vpop.eup %1389 }
 0x1ce   :  { %1403 = vtanh.f32 %v573_v46  ;;  %v708_v49 = vsel %vm705_vm10, %v682_v52, %v1763_v35  ;;  %v594_v53 = vadd.f32 %v1231_v6, %v1887_v40 }
 0x1cf   :  { %v585_v54 = vpop.f32.mrf.mxu1  ;;  %1257 = vmatprep.mubr.msk.bf16.mxu0 %vm114_vm0, %v708_v49 }
 0x1d0   :  { %1258 = vmatmul.mubr.msk.bf16.gmra.mxu0 %vm114_vm0, %v709_v56  ;;  %v586_v32 = vadd.f32 %v1887_v40, %v585_v54  ;;  %1405 = vtanh.f32 %v594_v53 }
 0x1d1   :  { %v1392_v58 = vpop.eup %1391  ;;  %v1232_v59 = vpop.f32.mrf.mxu1 }
 0x1d2   :  { %v1394_v61 = vpop.eup %1393  ;;  %v597_v24 = vadd.f32 %v1232_v59, %v1887_v40  ;;  %v685_v2 = vpack.c.bf16 %v1392_v58, %v1390_v55 }
 0x1d3   :  { %v1396_v35 = vpop.eup %1395  ;;  %v588_v1 = vpop.f32.mrf.mxu1 }
 0x1d4   :  { %1407 = vtanh.f32 %v597_v24  ;;  %v589_v3 = vadd.f32 %v1887_v40, %v588_v1  ;;  %v684_v43 = vpack.c.bf16 %v1396_v35, %v1394_v61  ;;  %v711_v8 = vsel %vm705_vm10, %v685_v2, %v1793_v11 }
 0x1d5   :  { %1409 = vtanh.f32 %v586_v32  ;;  %v1235_v60 = vpop.f32.mrf.mxu1  ;;  %v1398_v13 = vpop.eup %1397 }
 0x1d6   :  { %1411 = vtanh.f32 %v589_v3  ;;  %v710_v7 = vsel %vm705_vm10, %v684_v43, %v1783_v50  ;;  %v610_v5 = vadd.f32 %v1235_v60, %v1887_v40 }
 0x1d7   :  { %v601_v63 = vpop.f32.mrf.mxu1  ;;  %1261 = vmatprep.mubr.msk.bf16.mxu0 %vm114_vm0, %v710_v7 }
 0x1d8   :  { %1262 = vmatmul.mubr.msk.bf16.gmra.mxu0 %vm114_vm0, %v711_v8  ;;  %v602_v38 = vadd.f32 %v1887_v40, %v601_v63  ;;  %1413 = vtanh.f32 %v610_v5 }
 0x1d9   :  { %v1400_v14 = vpop.eup %1399  ;;  %v1236_v9 = vpop.f32.mrf.mxu1 }
 0x1da   :  { %v1402_v0 = vpop.eup %1401  ;;  %v613_v18 = vadd.f32 %v1236_v9, %v1887_v40  ;;  %v687_v23 = vpack.c.bf16 %v1400_v14, %v1398_v13 }
 0x1db   :  { %v1404_v50 = vpop.eup %1403  ;;  %v604_v21 = vpop.f32.mrf.mxu1 }
 0x1dc   :  { %1415 = vtanh.f32 %v613_v18  ;;  %v605_v25 = vadd.f32 %v1887_v40, %v604_v21  ;;  %v686_v26 = vpack.c.bf16 %v1404_v50, %v1402_v0  ;;  %v713_v15 = vsel %vm705_vm10, %v687_v23, %v1818_v17 }
 0x1dd   :  { %1417 = vtanh.f32 %v602_v38  ;;  %v1239_v11 = vpop.f32.mrf.mxu1  ;;  %v1406_v27 = vpop.eup %1405 }
 0x1de   :  { %1419 = vtanh.f32 %v605_v25  ;;  %v712_v30 = vsel %vm705_vm10, %v686_v26, %v1803_v10  ;;  %v626_v36 = vadd.f32 %v1239_v11, %v1887_v40 }
 0x1df   :  { %v617_v37 = vpop.f32.mrf.mxu1  ;;  %1265 = vmatprep.mubr.msk.bf16.mxu0 %vm114_vm0, %v712_v30 }
 0x1e0   :  { %1266 = vmatmul.mubr.msk.bf16.gmra.mxu0 %vm114_vm0, %v713_v15  ;;  %v618_v16 = vadd.f32 %v1887_v40, %v617_v37  ;;  %1421 = vtanh.f32 %v626_v36 }
 0x1e1   :  { %v1408_v22 = vpop.eup %1407  ;;  %v1240_v39 = vpop.f32.mrf.mxu1 }
 0x1e2   :  { %v1410_v20 = vpop.eup %1409  ;;  %v629_v28 = vadd.f32 %v1240_v39, %v1887_v40  ;;  %v689_v4 = vpack.c.bf16 %v1408_v22, %v1406_v27 }
 0x1e3   :  { %v1412_v10 = vpop.eup %1411  ;;  %v620_v41 = vpop.f32.mrf.mxu1 }
 0x1e4   :  { %1423 = vtanh.f32 %v629_v28  ;;  %v621_v42 = vadd.f32 %v1887_v40, %v620_v41  ;;  %v688_v47 = vpack.c.bf16 %v1412_v10, %v1410_v20  ;;  %v715_v46 = vsel %vm705_vm10, %v689_v4, %v1834_v29 }
 0x1e5   :  { %1425 = vtanh.f32 %v618_v16  ;;  %v1243_v17 = vpop.f32.mrf.mxu1  ;;  %v1414_v52 = vpop.eup %1413 }
 0x1e6   :  { %1427 = vtanh.f32 %v621_v42  ;;  %v714_v62 = vsel %vm705_vm10, %v688_v47, %v1808_v12  ;;  %v642_v48 = vadd.f32 %v1243_v17, %v1887_v40 }
 0x1e7   :  { %v633_v45 = vpop.f32.mrf.mxu1  ;;  %1269 = vmatprep.mubr.msk.bf16.mxu0 %vm114_vm0, %v714_v62 }
 0x1e8   :  { %1270 = vmatmul.mubr.msk.bf16.gmra.mxu0 %vm114_vm0, %v715_v46  ;;  %v634_v49 = vadd.f32 %v1887_v40, %v633_v45  ;;  %1429 = vtanh.f32 %v642_v48 }
 0x1e9   :  { %v1416_v6 = vpop.eup %1415  ;;  %v1244_v53 = vpop.f32.mrf.mxu1 }
 0x1ea   :  { %v1418_v54 = vpop.eup %1417  ;;  %v645_v56 = vadd.f32 %v1244_v53, %v1887_v40  ;;  %v691_v58 = vpack.c.bf16 %v1416_v6, %v1414_v52 }
 0x1eb   :  { %v1420_v12 = vpop.eup %1419  ;;  %v636_v55 = vpop.f32.mrf.mxu1 }
 0x1ec   :  { %1431 = vtanh.f32 %v645_v56  ;;  %v637_v32 = vadd.f32 %v1887_v40, %v636_v55  ;;  %v690_v59 = vpack.c.bf16 %v1420_v12, %v1418_v54  ;;  %v717_v61 = vsel %vm705_vm10, %v691_v58, %v1848_v19 }
 0x1ed   :  { %1433 = vtanh.f32 %v634_v49  ;;  %v1422_v24 = vpop.eup %1421 }
 0x1ee   :  { %1435 = vtanh.f32 %v637_v32  ;;  %v716_v29 = vsel %vm705_vm10, %v690_v59, %v1828_v51 }
 0x1ef   :  { %1273 = vmatprep.mubr.msk.bf16.mxu0 %vm114_vm0, %v716_v29 }
 0x1f0   :  { %1274 = vmatmul.mubr.msk.bf16.gmra.mxu0 %vm114_vm0, %v717_v61 }
 0x1f1   :  { %v1424_v35 = vpop.eup %1423 }
 0x1f2   :  { %v1426_v1 = vpop.eup %1425  ;;  %v693_v40 = vpack.c.bf16 %v1424_v35, %v1422_v24 }
 0x1f3   :  { %v1428_v2 = vpop.eup %1427 }
 0x1f4   :  { %v692_v3 = vpack.c.bf16 %v1428_v2, %v1426_v1  ;;  %v719_v51 = vsel %vm705_vm10, %v693_v40, %v1862_v33 }
 0x1f5   :  { %v1430_v60 = vpop.eup %1429 }
 0x1f6   :  { %v718_v43 = vsel %vm705_vm10, %v692_v3, %v1843_v57 }
 0x1f7   :  { %1277 = vmatprep.mubr.msk.bf16.mxu0 %vm114_vm0, %v718_v43 }
 0x1f8   :  { %1278 = vmatmul.mubr.msk.bf16.gmra.mxu0 %vm114_vm0, %v719_v51 }
 0x1f9   :  { %v1432_v19 = vpop.eup %1431 }
 0x1fa   :  { %v1434_v7 = vpop.eup %1433  ;;  %v695_v63 = vpack.c.bf16 %v1432_v19, %v1430_v60 }
 0x1fb   :  { %v1436_v5 = vpop.eup %1435 }
 0x1fc   :  { %v694_v8 = vpack.c.bf16 %v1436_v5, %v1434_v7  ;;  %v721_v57 = vsel %vm705_vm10, %v695_v63, %v1871_v31 }
 0x1fe   :  { %v720_v13 = vsel %vm705_vm10, %v694_v8, %v1857_v34 }
 0x1ff   :  { %1281 = vmatprep.mubr.msk.bf16.mxu0 %vm114_vm0, %v720_v13 }
 0x200   :  { %1282 = vmatmul.mubr.msk.bf16.gmra.mxu0 %vm114_vm0, %v721_v57 }
 0x288   :  { %v1255_v33 = vpop.f32.mrf.mxu0 }
 0x289   :  { %v965_v14 = vmax.f32 %v1255_v33, 0.0 }
 0x28a   :  { %v836_v38 = vpop.f32.mrf.mxu0 }
 0x28b   :  { %997 = vst [vmem:[#allocation2 + $0x10] sm:$0xff] %v965_v14  ;;  %v963_v9 = vmax.f32 %v836_v38, 0.0 }
 0x28c   :  { %v1256_v0 = vpop.f32.mrf.mxu0 }
 0x28d   :  { %995 = vst [vmem:[#allocation2] sm:$0xff] %v963_v9  ;;  %v966_v18 = vmax.f32 %v1256_v0, 0.0 }
 0x28e   :  { %v839_v50 = vpop.f32.mrf.mxu0 }
 0x28f   :  { %998 = vst [vmem:[#allocation2 + $0x18] sm:$0xff] %v966_v18  ;;  %v964_v21 = vmax.f32 %v839_v50, 0.0 }
 0x290   :  { %v1259_v34 = vpop.f32.mrf.mxu0 }
 0x291   :  { %996 = vst [vmem:[#allocation2 + $0x8] sm:$0xff] %v964_v21  ;;  %v969_v23 = vmax.f32 %v1259_v34, 0.0 }
 0x292   :  { %v852_v25 = vpop.f32.mrf.mxu0 }
 0x293   :  { %1001 = vst [vmem:[#allocation2 + $0x30] sm:$0xff] %v969_v23  ;;  %v967_v44 = vmax.f32 %v852_v25, 0.0 }
 0x294   :  { %v1260_v31 = vpop.f32.mrf.mxu0 }
 0x295   :  { %999 = vst [vmem:[#allocation2 + $0x20] sm:$0xff] %v967_v44  ;;  %v970_v26 = vmax.f32 %v1260_v31, 0.0 }
 0x296   :  { %v855_v11 = vpop.f32.mrf.mxu0 }
 0x297   :  { %1002 = vst [vmem:[#allocation2 + $0x38] sm:$0xff] %v970_v26  ;;  %v968_v30 = vmax.f32 %v855_v11, 0.0 }
 0x298   :  { %v1263_v36 = vpop.f32.mrf.mxu0 }
 0x299   :  { %1000 = vst [vmem:[#allocation2 + $0x28] sm:$0xff] %v968_v30  ;;  %v973_v37 = vmax.f32 %v1263_v36, 0.0 }
 0x29a   :  { %v868_v15 = vpop.f32.mrf.mxu0 }
 0x29b   :  { %1005 = vst [vmem:[#allocation2 + $0x50] sm:$0xff] %v973_v37  ;;  %v971_v27 = vmax.f32 %v868_v15, 0.0 }
 0x29c   :  { %v1264_v22 = vpop.f32.mrf.mxu0 }
 0x29d   :  { %1003 = vst [vmem:[#allocation2 + $0x40] sm:$0xff] %v971_v27  ;;  %v974_v16 = vmax.f32 %v1264_v22, 0.0 }
 0x29e   :  { %v871_v39 = vpop.f32.mrf.mxu0 }
 0x29f   :  { %1006 = vst [vmem:[#allocation2 + $0x58] sm:$0xff] %v974_v16  ;;  %v972_v20 = vmax.f32 %v871_v39, 0.0 }
 0x2a0   :  { %v1267_v28 = vpop.f32.mrf.mxu0 }
 0x2a1   :  { %1004 = vst [vmem:[#allocation2 + $0x48] sm:$0xff] %v972_v20  ;;  %v977_v10 = vmax.f32 %v1267_v28, 0.0 }
 0x2a2   :  { %v884_v41 = vpop.f32.mrf.mxu0 }
 0x2a3   :  { %1009 = vst [vmem:[#allocation2 + $0x70] sm:$0xff] %v977_v10  ;;  %v975_v4 = vmax.f32 %v884_v41, 0.0 }
 0x2a4   :  { %v1268_v42 = vpop.f32.mrf.mxu0 }
 0x2a5   :  { %1007 = vst [vmem:[#allocation2 + $0x60] sm:$0xff] %v975_v4  ;;  %v978_v47 = vmax.f32 %v1268_v42, 0.0 }
 0x2a6   :  { %v887_v17 = vpop.f32.mrf.mxu0 }
 0x2a7   :  { %1010 = vst [vmem:[#allocation2 + $0x78] sm:$0xff] %v978_v47  ;;  %v976_v62 = vmax.f32 %v887_v17, 0.0 }
 0x2a8   :  { %v1271_v48 = vpop.f32.mrf.mxu0 }
 0x2a9   :  { %1008 = vst [vmem:[#allocation2 + $0x68] sm:$0xff] %v976_v62  ;;  %v981_v45 = vmax.f32 %v1271_v48, 0.0 }
 0x2aa   :  { %v900_v46 = vpop.f32.mrf.mxu0 }
 0x2ab   :  { %1013 = vst [vmem:[#allocation2 + $0x90] sm:$0xff] %v981_v45  ;;  %v979_v52 = vmax.f32 %v900_v46, 0.0 }
 0x2ac   :  { %v1272_v6 = vpop.f32.mrf.mxu0 }
 0x2ad   :  { %1011 = vst [vmem:[#allocation2 + $0x80] sm:$0xff] %v979_v52  ;;  %v982_v49 = vmax.f32 %v1272_v6, 0.0 }
 0x2ae   :  { %v903_v53 = vpop.f32.mrf.mxu0 }
 0x2af   :  { %1014 = vst [vmem:[#allocation2 + $0x98] sm:$0xff] %v982_v49  ;;  %v980_v54 = vmax.f32 %v903_v53, 0.0 }
 0x2b0   :  { %v1275_v56 = vpop.f32.mrf.mxu0 }
 0x2b1   :  { %1012 = vst [vmem:[#allocation2 + $0x88] sm:$0xff] %v980_v54  ;;  %v985_v12 = vmax.f32 %v1275_v56, 0.0 }
 0x2b2   :  { %v916_v55 = vpop.f32.mrf.mxu0 }
 0x2b3   :  { %1017 = vst [vmem:[#allocation2 + $0xb0] sm:$0xff] %v985_v12  ;;  %v983_v58 = vmax.f32 %v916_v55, 0.0 }
 0x2b4   :  { %v1276_v32 = vpop.f32.mrf.mxu0 }
 0x2b5   :  { %1015 = vst [vmem:[#allocation2 + $0xa0] sm:$0xff] %v983_v58  ;;  %v986_v59 = vmax.f32 %v1276_v32, 0.0 }
 0x2b6   :  { %v919_v29 = vpop.f32.mrf.mxu0 }
 0x2b7   :  { %1018 = vst [vmem:[#allocation2 + $0xb8] sm:$0xff] %v986_v59  ;;  %v984_v61 = vmax.f32 %v919_v29, 0.0 }
 0x2b8   :  { %v1279_v24 = vpop.f32.mrf.mxu0 }
 0x2b9   :  { %1016 = vst [vmem:[#allocation2 + $0xa8] sm:$0xff] %v984_v61  ;;  %v989_v35 = vmax.f32 %v1279_v24, 0.0 }
 0x2ba   :  { %v932_v1 = vpop.f32.mrf.mxu0 }
 0x2bb   :  { %1021 = vst [vmem:[#allocation2 + $0xd0] sm:$0xff] %v989_v35  ;;  %v987_v2 = vmax.f32 %v932_v1, 0.0 }
 0x2bc   :  { %v1280_v40 = vpop.f32.mrf.mxu0 }
 0x2bd   :  { %1019 = vst [vmem:[#allocation2 + $0xc0] sm:$0xff] %v987_v2  ;;  %v990_v3 = vmax.f32 %v1280_v40, 0.0 }
 0x2be   :  { %v935_v43 = vpop.f32.mrf.mxu0 }
 0x2bf   :  { %1022 = vst [vmem:[#allocation2 + $0xd8] sm:$0xff] %v990_v3  ;;  %v988_v51 = vmax.f32 %v935_v43, 0.0 }
 0x2c0   :  { %v1283_v60 = vpop.f32.mrf.mxu0 }
 0x2c1   :  { %1020 = vst [vmem:[#allocation2 + $0xc8] sm:$0xff] %v988_v51  ;;  %v993_v19 = vmax.f32 %v1283_v60, 0.0 }
 0x2c2   :  { %v948_v7 = vpop.f32.mrf.mxu0 }
 0x2c3   :  { %1025 = vst [vmem:[#allocation2 + $0xf0] sm:$0xff] %v993_v19  ;;  %v991_v5 = vmax.f32 %v948_v7, 0.0 }
 0x2c4   :  { %v1284_v63 = vpop.f32.mrf.mxu0 }
 0x2c5   :  { %1023 = vst [vmem:[#allocation2 + $0xe0] sm:$0xff] %v991_v5  ;;  %v994_v8 = vmax.f32 %v1284_v63, 0.0 }
 0x2c6   :  { %v951_v13 = vpop.f32.mrf.mxu0 }
 0x2c7   :  { %1026 = vst [vmem:[#allocation2 + $0xf8] sm:$0xff] %v994_v8  ;;  %v992_v57 = vmax.f32 %v951_v13, 0.0 }
 0x2c9   :  { %1024 = vst [vmem:[#allocation2 + $0xe8] sm:$0xff] %v992_v57 }
 0x2ca   :  { %1448 = shalt.err (!%p1445_p4)
}
 0x2cb   :  { %s1461_s12 = smov 128   ;;  %s1462_s13 = smov 8  }
 0x2cc   :  { %1038 = dma.vmem_to_hbm [thread:$0]  %s1033_s5, 4096, %s2002_s6, [#allocation3], %s1461_s12, %s1461_s12, %s1462_s13  }
 0x2cd   :  { %1457 = dma.done.wait [#allocation3], 4096  }
 0x2ce   :  { %1458 = vsyncadd [#allocation3], 4294963200 }
 0x2cf   :  { %1042 = vsyncpa [#allocation3], 1 }

</bundles_post_ra>
